<compile_context>
chip_gen: v6e
topology: v6e:2x2x1
jax: 0.10.0
libtpu: 0.0.40
codegen_flags: <defaults>
</compile_context>

<pallas_src>
import jax
import jax.numpy as jnp
from jax.experimental import pallas as pl
from jax.experimental.pallas import tpu as pltpu


_COMPUTE_DTYPE = jnp.bfloat16   # MXU-native on v5e/v6e/v7x; accumulation stays f32.


# ----------------------------------------------------------------------------
# Fused kernel: up1 -> up2 -> ConvTranspose1d depatch, one row tile per step.
# ----------------------------------------------------------------------------
def _fused_unet_depatch_kernel(x_ref, x1a_ref, x1b_ref,
                               x20_ref, x21_ref, x22_ref, x23_ref,
                               w1x_ref, w1s_ref, w2x_ref, w2s_ref, wd_ref,
                               o_ref):
    """Rows = coarse tokens (B*T flattened).

    x_ref            : (tm, F0)    coarse features
    x1a/x1b_ref      : (tm, F1)    up1 skip, fine token r = 0 / 1 of each coarse token
    x20..x23_ref     : (tm, F2)    up2 skip, finest token s = 0..3 of each coarse token
    w1x/w1s          : (F0, h2) / (F1, h2)   up1 weight split (concat == sum of dots)
    w2x/w2s          : (h2, H)  / (F2, H)    up2 weight split
    wd_ref           : (H, P*C)              ConvTranspose1d weight, pre-transposed
    o_ref            : (tm, 4*P*C)           4 finest tokens of each coarse token, in lanes
    """
    f32 = jnp.float32
    ncols = wd_ref.shape[1]

    # Hoist single reads of every weight above the unrolled body.
    w1x = w1x_ref[...]
    w1s = w1s_ref[...]
    w2x = w2x_ref[...]
    w2s = w2s_ref[...]
    wd = wd_ref[...]

    x1 = (x1a_ref[...], x1b_ref[...])
    x2 = (x20_ref[...], x21_ref[...], x22_ref[...], x23_ref[...])

    # up1 "x" branch: shared by both fine tokens of this coarse token.
    a = jnp.dot(x_ref[...], w1x, preferred_element_type=f32)            # (tm, h2)

    for r in range(2):                                   # up1 x2-upsample phase
        u1 = jnp.maximum(a + jnp.dot(x1[r], w1s, preferred_element_type=f32), 0.0)
        b = jnp.dot(u1.astype(w2x.dtype), w2x, preferred_element_type=f32)   # (tm, H)
        for s2 in range(2):                              # up2 x2-upsample phase
            s = 2 * r + s2
            u2 = jnp.maximum(b + jnp.dot(x2[s], w2s, preferred_element_type=f32), 0.0)
            y = jnp.dot(u2.astype(wd.dtype), wd, preferred_element_type=f32)  # (tm, P*C)
            # Lane-dense, 128-aligned store whenever P*C % 128 == 0
            # (true for the real module: 64 * 12 = 768).
            o_ref[:, s * ncols:(s + 1) * ncols] = y.astype(o_ref.dtype)


# ----------------------------------------------------------------------------
# Host-side sizing helpers
# ----------------------------------------------------------------------------
def _round_up(n, m):
    return ((n + m - 1) // m) * m


def _vmem_budget_and_limit():
    """Generation-aware (budget, vmem_limit_bytes) derived from physical VMEM."""
    try:
        cap = pltpu.get_tpu_info().vmem_capacity_bytes
    except Exception:
        cap = 64 * 1024 * 1024            # conservative fallback: size like v7x
    if cap >= 100 * 1024 * 1024:          # v5e / v6e: 128 MiB physical
        return 96 * 1024 * 1024, 110 * 1024 * 1024
    # v7x: 64 MiB physical per TensorCore
    return 44 * 1024 * 1024, 56 * 1024 * 1024


def _pick_tm(M, f0, f1, f2, h2, H, ncols,
             in_itemsize, out_itemsize, w_itemsize, w_buffers,
             budget_bytes, tm_min=8, tm_max=1024):
    """Largest row tile (multiple of 8, <=tm_max) whose VMEM estimate fits the budget,
    then capped so the grid has >=4 steps (keeps both v7x TensorCores busy)."""
    if M <= tm_min:
        return M
    lane = lambda n: _round_up(n, 128)     # count lane padding as real VMEM
    per_row = (
        # double-buffered input blocks: x, 2 x1 splits, 4 x2 splits
        2 * in_itemsize * (lane(f0) + 2 * lane(f1) + 4 * lane(f2))
        # double-buffered output block (output itemsize, not input)
        + 2 * out_itemsize * lane(4 * ncols)
        # live f32 intermediates (a, u1, b, u2, y) + bf16 copies fed to the next dot
        + 4 * (2 * lane(h2) + 2 * lane(H) + lane(ncols))
        + in_itemsize * (lane(h2) + lane(H))
    )
    w_bytes = w_buffers * w_itemsize * (
        f0 * h2 + f1 * h2 + h2 * H + f2 * H + H * ncols)
    tm = tm_max
    while tm > tm_min and tm * per_row + w_bytes > budget_bytes:
        tm //= 2
    # >= 4 grid steps so a "parallel" row axis actually feeds 2 TCs on v7x
    # (harmless on single-TC v5e/v6e).
    tm = min(tm, max(tm_min, _round_up(pl.cdiv(M, 4), tm_min)))
    return min(tm, M)


def _const_weight_spec(shape):
    """BlockSpec for a weight with a constant index_map (stays VMEM-resident).

    Single-buffered via pipeline_mode=pl.Buffered(1) when supported
    (double-buffering a block whose index never changes is pure VMEM waste);
    falls back to the default spec on older JAX.  Returns (spec, buffer_count).
    """
    index_map = lambda i: (0,) * len(shape)
    try:
        return pl.BlockSpec(shape, index_map, pipeline_mode=pl.Buffered(1)), 1
    except Exception:
        return pl.BlockSpec(shape, index_map), 2


# ----------------------------------------------------------------------------
# Module forward
# ----------------------------------------------------------------------------
@jax.jit
def unet_embed_patching(x, x1, x2, params):
    """UNetEmbedPatching.forward(x, x1, x2, _).

    x : (B, T,  F0)    x1 : (B, 2T, F1)    x2 : (B, 4T, F2)
    returns (B, 4*T*patch_size, num_channels), dtype = x.dtype
    """
    B, T, f0 = x.shape
    _, _, f1 = x1.shape
    _, _, f2 = x2.shape
    cdt = _COMPUTE_DTYPE
    out_dtype = x.dtype          # preserve module output dtype (switch to bf16 if
                                 # downstream tolerates it: halves store/DMA traffic)

    # ---- trace-time weight prep: splits + deconv pre-transpose + bf16 cast ----
    w1 = params["up1_w"]                       # (F0 + F1, h2)
    w2 = params["up2_w"]                       # (h2 + F2, H)
    wd = params["deconv_w"]                    # (H, C, P)  ConvTranspose1d layout
    h2 = w1.shape[1]
    H, C, P = wd.shape
    w1x, w1s = w1[:f0].astype(cdt), w1[f0:].astype(cdt)
    w2x, w2s = w2[:h2].astype(cdt), w2[h2:].astype(cdt)
    # wd2[h, p*C + c] = wd[h, c, p]  ->  output reshapes to (B, 4T*P, C) transpose-free
    wd2 = wd.transpose(0, 2, 1).reshape(H, P * C).astype(cdt)
    ncols = P * C

    # ---- fold the x2 / x4 upsampling into per-fine-token row views ----
    # Splitting the (small) skip tensors per fine token in the wrapper keeps every
    # in-kernel operand un-sliced (no misaligned lane slices when F1/F2 % 128 != 0).
    M = B * T
    xr = x.reshape(M, f0).astype(cdt)
    x1s = [x1[:, r::2, :].reshape(M, f1).astype(cdt) for r in range(2)]
    x2s = [x2[:, s::4, :].reshape(M, f2).astype(cdt) for s in range(4)]

    # ---- row tile + grid ----
    budget, vmem_limit = _vmem_budget_and_limit()
    w_spec_list, w_buffers = [], 2
    for shp in [(f0, h2), (f1, h2), (h2, H), (f2, H), (H, ncols)]:
        spec, nbuf = _const_weight_spec(shp)
        w_spec_list.append(spec)
        w_buffers = nbuf
    tm = _pick_tm(M, f0, f1, f2, h2, H, ncols,
                  in_itemsize=jnp.dtype(cdt).itemsize,
                  out_itemsize=jnp.dtype(out_dtype).itemsize,
                  w_itemsize=jnp.dtype(cdt).itemsize,
                  w_buffers=w_buffers,
                  budget_bytes=budget)
    grid = (pl.cdiv(M, tm),)                   # partial last tile: OOB rows discarded

    # ---- advisory cost estimate (lets XLA schedule around the fused call) ----
    flops = 2 * M * (f0 * h2 + 2 * f1 * h2 + 2 * h2 * H + 4 * f2 * H + 4 * H * ncols)
    bytes_in = jnp.dtype(cdt).itemsize * (
        M * (f0 + 2 * f1 + 4 * f2)
        + f0 * h2 + f1 * h2 + h2 * H + f2 * H + H * ncols)
    bytes_out = jnp.dtype(out_dtype).itemsize * M * 4 * ncols
    cost = pl.CostEstimate(flops=flops, transcendentals=0,
                           bytes_accessed=bytes_in + bytes_out)

    y = pl.pallas_call(
        _fused_unet_depatch_kernel,
        out_shape=jax.ShapeDtypeStruct((M, 4 * ncols), out_dtype),
        grid=grid,
        in_specs=[
            pl.BlockSpec((tm, f0), lambda i: (i, 0)),
            pl.BlockSpec((tm, f1), lambda i: (i, 0)),
            pl.BlockSpec((tm, f1), lambda i: (i, 0)),
            pl.BlockSpec((tm, f2), lambda i: (i, 0)),
            pl.BlockSpec((tm, f2), lambda i: (i, 0)),
            pl.BlockSpec((tm, f2), lambda i: (i, 0)),
            pl.BlockSpec((tm, f2), lambda i: (i, 0)),
            # Weights: constant index_map (VMEM-resident), single-buffered if possible.
            *w_spec_list,
        ],
        out_specs=pl.BlockSpec((tm, 4 * ncols), lambda i: (i, 0)),
        compiler_params=pltpu.CompilerParams(
            dimension_semantics=("parallel",),   # shard rows over v7x's 2 TCs
            vmem_limit_bytes=vmem_limit,
        ),
        cost_estimate=cost,
    )(xr, x1s[0], x1s[1], x2s[0], x2s[1], x2s[2], x2s[3],
      w1x, w1s, w2x, w2s, wd2)

    # (B*T, 4*P*C) -> (B, 4T*P, C): pure row-major reshape, no transpose.
    return y.reshape(B, 4 * T * P, C)


# ----------------------------------------------------------------------------
# Pure-JAX f32 reference (same stand-in semantics) for a correctness check
# ----------------------------------------------------------------------------
def _reference(x, x1, x2, params):
    def up(h, skip, w):
        h_up = jnp.repeat(h, 2, axis=1)
        return jax.nn.relu(jnp.concatenate([h_up, skip], axis=-1) @ w)

    h = up(x, x1, params["up1_w"])
    h = up(h, x2, params["up2_w"])
    W = params["deconv_w"]                     # (H, C, P)
    H, C, P = W.shape
    y = jnp.einsum("bth,hcp->btpc", h, W)      # ConvTranspose1d(k=s=P, no bias)
    B, T = h.shape[:2]
    return y.reshape(B, T * P, C)


# ----------------------------------------------------------------------------
# Deterministic parameter init + smoke test
# ----------------------------------------------------------------------------
def init_params(key, patch_size, num_hiddens, num_channels):
    k1, k2, k3 = jax.random.split(key, 3)
    h4, h2 = num_hiddens // 4, num_hiddens // 2
    return {
        # up1 stand-in: (x feat h4) + (skip feat h4) -> h2
        "up1_w": jax.random.normal(k1, (h4 + h4, h2), jnp.float32) * 0.05,
        # up2 stand-in: (x feat h2) + (skip feat h2) -> num_hiddens
        "up2_w": jax.random.normal(k2, (h2 + h2, num_hiddens), jnp.float32) * 0.05,
        # ConvTranspose1d weight: (in_channels=num_hiddens, out_channels, kernel=patch)
        "deconv_w": jax.random.normal(
            k3, (num_hiddens, num_channels, patch_size), jnp.float32) * 0.05,
    }


if __name__ == "__main__":
    # small shapes: patch_size=8, num_hiddens=32, num_channels=4, B=2, T=4
    patch_size, num_hiddens, num_channels = 8, 32, 4
    B, T = 2, 4

    key = jax.random.PRNGKey(0)
    kx, k1, k2, kp = jax.random.split(key, 4)
    x = jax.random.normal(kx, (B, T, num_hiddens // 4), jnp.float32)
    x1 = jax.random.normal(k1, (B, 2 * T, num_hiddens // 4), jnp.float32)
    x2 = jax.random.normal(k2, (B, 4 * T, num_hiddens // 2), jnp.float32)
    params = init_params(kp, patch_size, num_hiddens, num_channels)

    out = unet_embed_patching(x, x1, x2, params)
    out = jax.block_until_ready(out)

    assert out.shape == (B, 4 * T * patch_size, num_channels), out.shape
    assert out.dtype == x.dtype, out.dtype

    ref = jax.block_until_ready(_reference(x, x1, x2, params))
    # bf16 compute (f32 accumulation) vs f32 reference: loosened tolerance.
    assert jnp.allclose(out, ref, atol=5e-3, rtol=5e-2), float(
        jnp.max(jnp.abs(out - ref)))

    print("KERNEL_OK")
</pallas_src>

<mosaic_0001>
module attributes {stable_mosaic.version = 11 : i64} {
  func.func @_fused_unet_depatch_kernel(%arg0: i32, %arg1: memref<8x8xbf16, #tpu.memory_space<vmem>>, %arg2: memref<8x8xbf16, #tpu.memory_space<vmem>>, %arg3: memref<8x8xbf16, #tpu.memory_space<vmem>>, %arg4: memref<8x16xbf16, #tpu.memory_space<vmem>>, %arg5: memref<8x16xbf16, #tpu.memory_space<vmem>>, %arg6: memref<8x16xbf16, #tpu.memory_space<vmem>>, %arg7: memref<8x16xbf16, #tpu.memory_space<vmem>>, %arg8: memref<8x16xbf16, #tpu.memory_space<vmem>>, %arg9: memref<8x16xbf16, #tpu.memory_space<vmem>>, %arg10: memref<16x32xbf16, #tpu.memory_space<vmem>>, %arg11: memref<16x32xbf16, #tpu.memory_space<vmem>>, %arg12: memref<32x32xbf16, #tpu.memory_space<vmem>>, %arg13: memref<8x128xf32, #tpu.memory_space<vmem>>) attributes {dimension_semantics = [#tpu.dimension_semantics<parallel>], iteration_bounds = array<i64: 1>, scalar_prefetch = 0 : i64, scratch_operands = 0 : i64, tpu.core_type = #tpu.core_type<tc>, window_params = [{transform_indices = @transform_0, window_bounds = array<i64: 8, 8>}, {transform_indices = @transform_1, window_bounds = array<i64: 8, 8>}, {transform_indices = @transform_2, window_bounds = array<i64: 8, 8>}, {transform_indices = @transform_3, window_bounds = array<i64: 8, 16>}, {transform_indices = @transform_4, window_bounds = array<i64: 8, 16>}, {transform_indices = @transform_5, window_bounds = array<i64: 8, 16>}, {transform_indices = @transform_6, window_bounds = array<i64: 8, 16>}, {pipeline_mode = #tpu.pipeline_mode<synchronous>, transform_indices = @transform_7, window_bounds = array<i64: 8, 16>}, {pipeline_mode = #tpu.pipeline_mode<synchronous>, transform_indices = @transform_8, window_bounds = array<i64: 8, 16>}, {pipeline_mode = #tpu.pipeline_mode<synchronous>, transform_indices = @transform_9, window_bounds = array<i64: 16, 32>}, {pipeline_mode = #tpu.pipeline_mode<synchronous>, transform_indices = @transform_10, window_bounds = array<i64: 16, 32>}, {pipeline_mode = #tpu.pipeline_mode<synchronous>, transform_indices = @transform_11, window_bounds = array<i64: 32, 32>}, {transform_indices = @transform_12, window_bounds = array<i64: 8, 128>}]} {
    %c0 = arith.constant 0 : index
    %c0_0 = arith.constant 0 : index
    %0 = vector.load %arg8[%c0, %c0_0] : memref<8x16xbf16, #tpu.memory_space<vmem>>, vector<8x16xbf16>
    %c0_1 = arith.constant 0 : index
    %c0_2 = arith.constant 0 : index
    %1 = vector.load %arg9[%c0_1, %c0_2] : memref<8x16xbf16, #tpu.memory_space<vmem>>, vector<8x16xbf16>
    %c0_3 = arith.constant 0 : index
    %c0_4 = arith.constant 0 : index
    %2 = vector.load %arg10[%c0_3, %c0_4] : memref<16x32xbf16, #tpu.memory_space<vmem>>, vector<16x32xbf16>
    %c0_5 = arith.constant 0 : index
    %c0_6 = arith.constant 0 : index
    %3 = vector.load %arg11[%c0_5, %c0_6] : memref<16x32xbf16, #tpu.memory_space<vmem>>, vector<16x32xbf16>
    %c0_7 = arith.constant 0 : index
    %c0_8 = arith.constant 0 : index
    %4 = vector.load %arg12[%c0_7, %c0_8] : memref<32x32xbf16, #tpu.memory_space<vmem>>, vector<32x32xbf16>
    %c0_9 = arith.constant 0 : index
    %c0_10 = arith.constant 0 : index
    %5 = vector.load %arg2[%c0_9, %c0_10] : memref<8x8xbf16, #tpu.memory_space<vmem>>, vector<8x8xbf16>
    %c0_11 = arith.constant 0 : index
    %c0_12 = arith.constant 0 : index
    %6 = vector.load %arg3[%c0_11, %c0_12] : memref<8x8xbf16, #tpu.memory_space<vmem>>, vector<8x8xbf16>
    %c0_13 = arith.constant 0 : index
    %c0_14 = arith.constant 0 : index
    %7 = vector.load %arg4[%c0_13, %c0_14] : memref<8x16xbf16, #tpu.memory_space<vmem>>, vector<8x16xbf16>
    %c0_15 = arith.constant 0 : index
    %c0_16 = arith.constant 0 : index
    %8 = vector.load %arg5[%c0_15, %c0_16] : memref<8x16xbf16, #tpu.memory_space<vmem>>, vector<8x16xbf16>
    %c0_17 = arith.constant 0 : index
    %c0_18 = arith.constant 0 : index
    %9 = vector.load %arg6[%c0_17, %c0_18] : memref<8x16xbf16, #tpu.memory_space<vmem>>, vector<8x16xbf16>
    %c0_19 = arith.constant 0 : index
    %c0_20 = arith.constant 0 : index
    %10 = vector.load %arg7[%c0_19, %c0_20] : memref<8x16xbf16, #tpu.memory_space<vmem>>, vector<8x16xbf16>
    %c0_21 = arith.constant 0 : index
    %c0_22 = arith.constant 0 : index
    %11 = vector.load %arg1[%c0_21, %c0_22] : memref<8x8xbf16, #tpu.memory_space<vmem>>, vector<8x8xbf16>
    %cst = arith.constant dense<0.000000e+00> : vector<8x16xf32>
    %12 = tpu.matmul %11, %0, %cst {dimension_numbers = #tpu.dot_dimension_numbers<[1], [0], [0], [1], [0, 0, 1, 1], [], []>} : vector<8x8xbf16>, vector<8x16xbf16>, vector<8x16xf32> -> vector<8x16xf32>
    %cst_23 = arith.constant dense<0.000000e+00> : vector<8x16xf32>
    %13 = tpu.matmul %5, %1, %cst_23 {dimension_numbers = #tpu.dot_dimension_numbers<[1], [0], [0], [1], [0, 0, 1, 1], [], []>} : vector<8x8xbf16>, vector<8x16xbf16>, vector<8x16xf32> -> vector<8x16xf32>
    %14 = arith.addf %12, %13 : vector<8x16xf32>
    %cst_24 = arith.constant 0.000000e+00 : f32
    %15 = vector.broadcast %cst_24 : f32 to vector<8x16xf32>
    %16 = arith.maximumf %14, %15 : vector<8x16xf32>
    %17 = arith.truncf %16 : vector<8x16xf32> to vector<8x16xbf16>
    %cst_25 = arith.constant dense<0.000000e+00> : vector<8x32xf32>
    %18 = tpu.matmul %17, %2, %cst_25 {dimension_numbers = #tpu.dot_dimension_numbers<[1], [0], [0], [1], [0, 0, 1, 1], [], []>} : vector<8x16xbf16>, vector<16x32xbf16>, vector<8x32xf32> -> vector<8x32xf32>
    %cst_26 = arith.constant dense<0.000000e+00> : vector<8x32xf32>
    %19 = tpu.matmul %7, %3, %cst_26 {dimension_numbers = #tpu.dot_dimension_numbers<[1], [0], [0], [1], [0, 0, 1, 1], [], []>} : vector<8x16xbf16>, vector<16x32xbf16>, vector<8x32xf32> -> vector<8x32xf32>
    %20 = arith.addf %18, %19 : vector<8x32xf32>
    %cst_27 = arith.constant 0.000000e+00 : f32
    %21 = vector.broadcast %cst_27 : f32 to vector<8x32xf32>
    %22 = arith.maximumf %20, %21 : vector<8x32xf32>
    %23 = arith.truncf %22 : vector<8x32xf32> to vector<8x32xbf16>
    %cst_28 = arith.constant dense<0.000000e+00> : vector<8x32xf32>
    %24 = tpu.matmul %23, %4, %cst_28 {dimension_numbers = #tpu.dot_dimension_numbers<[1], [0], [0], [1], [0, 0, 1, 1], [], []>} : vector<8x32xbf16>, vector<32x32xbf16>, vector<8x32xf32> -> vector<8x32xf32>
    %c0_29 = arith.constant 0 : index
    %c0_30 = arith.constant 0 : index
    %25 = vector.load %arg13[%c0_29, %c0_30] : memref<8x128xf32, #tpu.memory_space<vmem>>, vector<8x32xf32>
    tpu.vector_store %arg13[%c0_29, %c0_30], %24 {strides = array<i32>} : memref<8x128xf32, #tpu.memory_space<vmem>>, vector<8x32xf32>,
    %cst_31 = arith.constant dense<0.000000e+00> : vector<8x32xf32>
    %26 = tpu.matmul %8, %3, %cst_31 {dimension_numbers = #tpu.dot_dimension_numbers<[1], [0], [0], [1], [0, 0, 1, 1], [], []>} : vector<8x16xbf16>, vector<16x32xbf16>, vector<8x32xf32> -> vector<8x32xf32>
    %27 = arith.addf %18, %26 : vector<8x32xf32>
    %cst_32 = arith.constant 0.000000e+00 : f32
    %28 = vector.broadcast %cst_32 : f32 to vector<8x32xf32>
    %29 = arith.maximumf %27, %28 : vector<8x32xf32>
    %30 = arith.truncf %29 : vector<8x32xf32> to vector<8x32xbf16>
    %cst_33 = arith.constant dense<0.000000e+00> : vector<8x32xf32>
    %31 = tpu.matmul %30, %4, %cst_33 {dimension_numbers = #tpu.dot_dimension_numbers<[1], [0], [0], [1], [0, 0, 1, 1], [], []>} : vector<8x32xbf16>, vector<32x32xbf16>, vector<8x32xf32> -> vector<8x32xf32>
    %c0_34 = arith.constant 0 : index
    %c32 = arith.constant 32 : index
    %32 = vector.load %arg13[%c0_34, %c32] : memref<8x128xf32, #tpu.memory_space<vmem>>, vector<8x32xf32>
    tpu.vector_store %arg13[%c0_34, %c32], %31 {strides = array<i32>} : memref<8x128xf32, #tpu.memory_space<vmem>>, vector<8x32xf32>,
    %cst_35 = arith.constant dense<0.000000e+00> : vector<8x16xf32>
    %33 = tpu.matmul %6, %1, %cst_35 {dimension_numbers = #tpu.dot_dimension_numbers<[1], [0], [0], [1], [0, 0, 1, 1], [], []>} : vector<8x8xbf16>, vector<8x16xbf16>, vector<8x16xf32> -> vector<8x16xf32>
    %34 = arith.addf %12, %33 : vector<8x16xf32>
    %cst_36 = arith.constant 0.000000e+00 : f32
    %35 = vector.broadcast %cst_36 : f32 to vector<8x16xf32>
    %36 = arith.maximumf %34, %35 : vector<8x16xf32>
    %37 = arith.truncf %36 : vector<8x16xf32> to vector<8x16xbf16>
    %cst_37 = arith.constant dense<0.000000e+00> : vector<8x32xf32>
    %38 = tpu.matmul %37, %2, %cst_37 {dimension_numbers = #tpu.dot_dimension_numbers<[1], [0], [0], [1], [0, 0, 1, 1], [], []>} : vector<8x16xbf16>, vector<16x32xbf16>, vector<8x32xf32> -> vector<8x32xf32>
    %cst_38 = arith.constant dense<0.000000e+00> : vector<8x32xf32>
    %39 = tpu.matmul %9, %3, %cst_38 {dimension_numbers = #tpu.dot_dimension_numbers<[1], [0], [0], [1], [0, 0, 1, 1], [], []>} : vector<8x16xbf16>, vector<16x32xbf16>, vector<8x32xf32> -> vector<8x32xf32>
    %40 = arith.addf %38, %39 : vector<8x32xf32>
    %cst_39 = arith.constant 0.000000e+00 : f32
    %41 = vector.broadcast %cst_39 : f32 to vector<8x32xf32>
    %42 = arith.maximumf %40, %41 : vector<8x32xf32>
    %43 = arith.truncf %42 : vector<8x32xf32> to vector<8x32xbf16>
    %cst_40 = arith.constant dense<0.000000e+00> : vector<8x32xf32>
    %44 = tpu.matmul %43, %4, %cst_40 {dimension_numbers = #tpu.dot_dimension_numbers<[1], [0], [0], [1], [0, 0, 1, 1], [], []>} : vector<8x32xbf16>, vector<32x32xbf16>, vector<8x32xf32> -> vector<8x32xf32>
    %c0_41 = arith.constant 0 : index
    %c64 = arith.constant 64 : index
    %45 = vector.load %arg13[%c0_41, %c64] : memref<8x128xf32, #tpu.memory_space<vmem>>, vector<8x32xf32>
    tpu.vector_store %arg13[%c0_41, %c64], %44 {strides = array<i32>} : memref<8x128xf32, #tpu.memory_space<vmem>>, vector<8x32xf32>,
    %cst_42 = arith.constant dense<0.000000e+00> : vector<8x32xf32>
    %46 = tpu.matmul %10, %3, %cst_42 {dimension_numbers = #tpu.dot_dimension_numbers<[1], [0], [0], [1], [0, 0, 1, 1], [], []>} : vector<8x16xbf16>, vector<16x32xbf16>, vector<8x32xf32> -> vector<8x32xf32>
    %47 = arith.addf %38, %46 : vector<8x32xf32>
    %cst_43 = arith.constant 0.000000e+00 : f32
    %48 = vector.broadcast %cst_43 : f32 to vector<8x32xf32>
    %49 = arith.maximumf %47, %48 : vector<8x32xf32>
    %50 = arith.truncf %49 : vector<8x32xf32> to vector<8x32xbf16>
    %cst_44 = arith.constant dense<0.000000e+00> : vector<8x32xf32>
    %51 = tpu.matmul %50, %4, %cst_44 {dimension_numbers = #tpu.dot_dimension_numbers<[1], [0], [0], [1], [0, 0, 1, 1], [], []>} : vector<8x32xbf16>, vector<32x32xbf16>, vector<8x32xf32> -> vector<8x32xf32>
    %c0_45 = arith.constant 0 : index
    %c96 = arith.constant 96 : index
    %52 = vector.load %arg13[%c0_45, %c96] : memref<8x128xf32, #tpu.memory_space<vmem>>, vector<8x32xf32>
    tpu.vector_store %arg13[%c0_45, %c96], %51 {strides = array<i32>} : memref<8x128xf32, #tpu.memory_space<vmem>>, vector<8x32xf32>,
    return
  }
  func.func @transform_0(%arg0: i32) -> (i32, i32) {
    %c0_i32 = arith.constant 0 : i32
    %c0_i32_0 = arith.constant 0 : i32
    return %arg0, %c0_i32 : i32, i32
  }
  func.func @transform_1(%arg0: i32) -> (i32, i32) {
    %c0_i32 = arith.constant 0 : i32
    %c0_i32_0 = arith.constant 0 : i32
    return %arg0, %c0_i32 : i32, i32
  }
  func.func @transform_2(%arg0: i32) -> (i32, i32) {
    %c0_i32 = arith.constant 0 : i32
    %c0_i32_0 = arith.constant 0 : i32
    return %arg0, %c0_i32 : i32, i32
  }
  func.func @transform_3(%arg0: i32) -> (i32, i32) {
    %c0_i32 = arith.constant 0 : i32
    %c0_i32_0 = arith.constant 0 : i32
    return %arg0, %c0_i32 : i32, i32
  }
  func.func @transform_4(%arg0: i32) -> (i32, i32) {
    %c0_i32 = arith.constant 0 : i32
    %c0_i32_0 = arith.constant 0 : i32
    return %arg0, %c0_i32 : i32, i32
  }
  func.func @transform_5(%arg0: i32) -> (i32, i32) {
    %c0_i32 = arith.constant 0 : i32
    %c0_i32_0 = arith.constant 0 : i32
    return %arg0, %c0_i32 : i32, i32
  }
  func.func @transform_6(%arg0: i32) -> (i32, i32) {
    %c0_i32 = arith.constant 0 : i32
    %c0_i32_0 = arith.constant 0 : i32
    return %arg0, %c0_i32 : i32, i32
  }
  func.func @transform_7(%arg0: i32) -> (i32, i32) {
    %c0_i32 = arith.constant 0 : i32
    %c0_i32_0 = arith.constant 0 : i32
    %c0_i32_1 = arith.constant 0 : i32
    return %c0_i32, %c0_i32_0 : i32, i32
  }
  func.func @transform_8(%arg0: i32) -> (i32, i32) {
    %c0_i32 = arith.constant 0 : i32
    %c0_i32_0 = arith.constant 0 : i32
    %c0_i32_1 = arith.constant 0 : i32
    return %c0_i32, %c0_i32_0 : i32, i32
  }
  func.func @transform_9(%arg0: i32) -> (i32, i32) {
    %c0_i32 = arith.constant 0 : i32
    %c0_i32_0 = arith.constant 0 : i32
    %c0_i32_1 = arith.constant 0 : i32
    return %c0_i32, %c0_i32_0 : i32, i32
  }
  func.func @transform_10(%arg0: i32) -> (i32, i32) {
    %c0_i32 = arith.constant 0 : i32
    %c0_i32_0 = arith.constant 0 : i32
    %c0_i32_1 = arith.constant 0 : i32
    return %c0_i32, %c0_i32_0 : i32, i32
  }
  func.func @transform_11(%arg0: i32) -> (i32, i32) {
    %c0_i32 = arith.constant 0 : i32
    %c0_i32_0 = arith.constant 0 : i32
    %c0_i32_1 = arith.constant 0 : i32
    return %c0_i32, %c0_i32_0 : i32, i32
  }
  func.func @transform_12(%arg0: i32) -> (i32, i32) {
    %c0_i32 = arith.constant 0 : i32
    %c0_i32_0 = arith.constant 0 : i32
    return %arg0, %c0_i32 : i32, i32
  }
}

</mosaic_0001>

<bundles_post_ra>
// kernel: unet_embed_patching.1
= control target key start
LH: loop header
LB: loop body
LE: loop exit
PB: predicated region body
PF: predicated region fallthrough
CT: control target
= control target key end

     0   :  { %vm63_vm0 = vcmask 1043456   ;;  %v835_v0 = vmov 0.0   ;;  %vm836_vm1 = vmmov 0   ;;  %vm59_vm2 = vcmask 64512   ;;  %s838_s22 = smov 64   ;;  %s839_s23 = smov 96   ;;  %s1035_s7 = inlined_call_operand.vmem [shape: bf16[8,16], index: 7, kind: input, shape index: {}]   ;;  %s1036_s8 = inlined_call_operand.vmem [shape: bf16[8,16], index: 8, kind: input, shape index: {}]   ;;  %s1037_s0 = inlined_call_operand.vmem [shape: bf16[8,8], index: 0, kind: input, shape index: {}]   ;;  %s1038_s1 = inlined_call_operand.vmem [shape: bf16[8,8], index: 1, kind: input, shape index: {}]   ;;  %s1039_s10 = inlined_call_operand.vmem [shape: bf16[16,32], index: 10, kind: input, shape index: {}]   ;;  %s1040_s9 = inlined_call_operand.vmem [shape: bf16[16,32], index: 9, kind: input, shape index: {}]   ;;  %s1041_s3 = inlined_call_operand.vmem [shape: bf16[8,16], index: 3, kind: input, shape index: {}]   ;;  %s1042_s4 = inlined_call_operand.vmem [shape: bf16[8,16], index: 4, kind: input, shape index: {}]   ;;  %s1043_s2 = inlined_call_operand.vmem [shape: bf16[8,8], index: 2, kind: input, shape index: {}]   ;;  %s1044_s11 = inlined_call_operand.vmem [shape: bf16[32,32], index: 11, kind: input, shape index: {}]   ;;  %s1045_s5 = inlined_call_operand.vmem [shape: bf16[8,16], index: 5, kind: input, shape index: {}]   ;;  %s1046_s6 = inlined_call_operand.vmem [shape: bf16[8,16], index: 6, kind: input, shape index: {}]   ;;  %s1047_s12 = inlined_call_operand.vmem [shape: f32[8,128], index: 12, kind: output, shape index: {}]  }
   0x1   :  { %740 = vmatprep.subr.bf16.mxu0 %v835_v0  ;;  %746 = vmatprep.subr.bf16.mxu1 %v835_v0  ;;  %v42_v1 = vld [vmem:[%s1035_s7] sm:$0xf]  ;;  %vm162_vm3 = vcmask 130048   ;;  %v971_v20 = vld [vmem:[%s1044_s11 + $0x8] sm:$0xff]   ;;  %vm270_vm4 = vcmask 261120   ;;  %vm408_vm5 = vcmask 523520  }
   0x2   :  { %v43_v2 = vld [vmem:[%s1036_s8] sm:$0xf]  ;;  %v65_v3 = vsel %vm63_vm0, %v42_v1, 0  ;;  %742 = vmatprep.mubr.msk.bf16.mxu0 %vm836_vm1, %v835_v0  ;;  %748 = vmatprep.mubr.msk.bf16.mxu1 %vm836_vm1, %v835_v0  ;;  %vm592_vm6 = vcmask 785920   ;;  %vm687_vm7 = vcmask 1048320  }
   0x3   :  { %v111_v4 = vsel %vm63_vm0, %v43_v2, 0  ;;  %v58_v5 = vld [vmem:[%s1037_s0] sm:$0xf]  ;;  %741 = vmatpush3.bf16.msra.mxu0 %v65_v3 }
   0x4   :  { %747 = vmatpush3.bf16.msra.mxu1 %v111_v4  ;;  %v52_v6 = vld [vmem:[%s1038_s1] sm:$0xf]  ;;  %752 = vmatprep.subr.bf16.mxu0 %v835_v0 }
   0x5   :  { %v926_v7 = vld [vmem:[%s1039_s10] sm:$0xff]   ;;  %758 = vmatprep.subr.bf16.mxu1 %v835_v0 }
   0x6   :  { %v933_v8 = vld [vmem:[%s1040_s9] sm:$0xff]   ;;  %743 = vmatmul.mubr.msk.bf16.vlgmr.msra.gmra.mxu0 %vm59_vm2, %v58_v5 }
   0x7   :  { %749 = vmatmul.mubr.msk.bf16.vlgmr.msra.gmra.mxu1 %vm59_vm2, %v52_v6  ;;  %753 = vmatpush3.bf16.msra.mxu0 %v933_v8  ;;  %v54_v9 = vld [vmem:[%s1041_s3] sm:$0xf] }
   0x8   :  { %759 = vmatpush3.bf16.msra.mxu1 %v926_v7  ;;  %760 = vmatprep.mubr.msk.bf16.mxu1 %vm836_vm1, %v835_v0  ;;  %v55_v10 = vld [vmem:[%s1042_s4] sm:$0xf] }
   0x9   :  { %772 = vmatprep.subr.bf16.mxu1 %v835_v0  ;;  %754 = vmatprep.mubr.msk.bf16.mxu0 %vm836_vm1, %v835_v0  ;;  %v53_v11 = vld [vmem:[%s1043_s2] sm:$0xf] }
   0xa   :  { %764 = vmatprep.subr.bf16.mxu0 %v835_v0  ;;  %v981_v37 = vld [vmem:[%s1044_s11] sm:$0xff]   ;;  %s837_s11 = smov 32  }
   0xb   :  { %v56_v38 = vld [vmem:[%s1045_s5] sm:$0xf] }
   0xc   :  { %v57_v39 = vld [vmem:[%s1046_s6] sm:$0xf] }
   0xf   :  { %761 = vmatmul.mubr.msk.bf16.vlgmr.msra.gmra.mxu1 %vm162_vm3, %v54_v9 }
  0x10   :  { %773 = vmatpush3.bf16.msra.mxu1 %v926_v7  ;;  %774 = vmatprep.mubr.msk.bf16.mxu1 %vm836_vm1, %v835_v0 }
  0x11   :  { %786 = vmatprep.subr.bf16.mxu1 %v835_v0 }
  0x17   :  { %775 = vmatmul.mubr.msk.bf16.vlgmr.msra.gmra.mxu1 %vm162_vm3, %v55_v10 }
  0x18   :  { %787 = vmatpush3.bf16.msra.mxu1 %v111_v4  ;;  %788 = vmatprep.mubr.msk.bf16.mxu1 %vm836_vm1, %v835_v0 }
  0x19   :  { %798 = vmatprep.subr.bf16.mxu1 %v835_v0 }
  0x1f   :  { %789 = vmatmul.mubr.msk.bf16.vlgmr.msra.gmra.mxu1 %vm59_vm2, %v53_v11 }
  0x20   :  { %799 = vmatpush3.bf16.msra.mxu1 %v926_v7  ;;  %800 = vmatprep.mubr.msk.bf16.mxu1 %vm836_vm1, %v835_v0 }
  0x21   :  { %812 = vmatprep.subr.bf16.mxu1 %v835_v0 }
  0x27   :  { %801 = vmatmul.mubr.msk.bf16.vlgmr.msra.gmra.mxu1 %vm162_vm3, %v56_v38 }
  0x28   :  { %813 = vmatpush3.bf16.msra.mxu1 %v926_v7  ;;  %814 = vmatprep.mubr.msk.bf16.mxu1 %vm836_vm1, %v835_v0 }
  0x2f   :  { %815 = vmatmul.mubr.msk.bf16.vlgmr.msra.gmra.mxu1 %vm162_vm3, %v57_v39 }
  0xc6   :  { %v101_v12 = vpop.f32.mrf.mxu0 }
  0xc7   :  { %v147_v13 = vpop.f32.mrf.mxu1 }
  0xc8   :  { %v153_v14 = vadd.f32 %v147_v13, %v101_v12  ;;  %v744_v15 = vpop.f32.mrf.mxu0 }
  0xc9   :  { %v750_v16 = vpop.f32.mrf.mxu1 }
  0xca   :  { %v154_v17 = vmax.f32 %v153_v14, 0.0  ;;  %v104_v18 = vpop.f32.mrf.mxu0 }
  0xcb   :  { %v150_v19 = vpop.f32.mrf.mxu1 }
  0xcc   :  { %v155_v21 = vpack.c.bf16 %v154_v17, %v154_v17  ;;  %v745_v22 = vpop.f32.mrf.mxu0 }
  0xcd   :  { %v751_v23 = vpop.f32.mrf.mxu1 }
  0xce   :  { %755 = vmatmul.mubr.msk.bf16.vlgmr.msra.gmra.mxu0 %vm162_vm3, %v155_v21 }
  0xcf   :  { %v249_v24 = vpop.f32.mrf.mxu1  ;;  %765 = vmatpush3.bf16.msra.mxu0 %v971_v20  ;;  %768 = vmatprep.mubr.msk.bf16.mxu0 %vm836_vm1, %v835_v0 }
  0xd0   :  { %766 = vmatprep.subr.bf16.mxu0 %v835_v0 }
  0xd1   :  { %v762_v25 = vpop.f32.mrf.mxu1 }
  0xd3   :  { %v252_v26 = vpop.f32.mrf.mxu1  ;;  %767 = vmatpush3.bf16.msra.mxu0 %v981_v37 }
  0xd4   :  { %778 = vmatprep.subr.bf16.mxu0 %v835_v0 }
  0xd5   :  { %v763_v27 = vpop.f32.mrf.mxu1 }
  0xd7   :  { %v352_v28 = vpop.f32.mrf.mxu1 }
  0xd9   :  { %v776_v29 = vpop.f32.mrf.mxu1 }
  0xdb   :  { %v355_v30 = vpop.f32.mrf.mxu1 }
  0xdd   :  { %v777_v31 = vpop.f32.mrf.mxu1 }
  0xdf   :  { %v447_v32 = vpop.f32.mrf.mxu1 }
  0xe0   :  { %v453_v33 = vadd.f32 %v447_v32, %v101_v12 }
  0xe1   :  { %v790_v34 = vpop.f32.mrf.mxu1 }
  0xe2   :  { %v454_v50 = vmax.f32 %v453_v33, 0.0 }
  0xe3   :  { %v450_v35 = vpop.f32.mrf.mxu1 }
  0xe4   :  { %v455_v51 = vpack.c.bf16 %v454_v50, %v454_v50 }
  0xe5   :  { %v791_v36 = vpop.f32.mrf.mxu1 }
  0xe7   :  { %v536_v52 = vpop.f32.mrf.mxu1 }
  0xe9   :  { %v802_v53 = vpop.f32.mrf.mxu1 }
  0xeb   :  { %v539_v54 = vpop.f32.mrf.mxu1 }
  0xed   :  { %v803_v55 = vpop.f32.mrf.mxu1 }
  0xef   :  { %v631_v56 = vpop.f32.mrf.mxu1 }
  0xf1   :  { %v816_v57 = vpop.f32.mrf.mxu1 }
  0xf3   :  { %v634_v58 = vpop.f32.mrf.mxu1 }
  0xf5   :  { %v817_v59 = vpop.f32.mrf.mxu1 }
 0x18e   :  { %v200_v40 = vpop.f32.mrf.mxu0 }
 0x18f   :  { %v255_v41 = vadd.f32 %v249_v24, %v200_v40  ;;  %v358_v46 = vadd.f32 %v352_v28, %v200_v40 }
 0x190   :  { %v756_v42 = vpop.f32.mrf.mxu0 }
 0x191   :  { %v256_v43 = vmax.f32 %v255_v41, 0.0  ;;  %v359_v48 = vmax.f32 %v358_v46, 0.0 }
 0x192   :  { %v203_v44 = vpop.f32.mrf.mxu0 }
 0x193   :  { %v257_v45 = vpack.c.bf16 %v256_v43, %v256_v43  ;;  %v360_v49 = vpack.c.bf16 %v359_v48, %v359_v48 }
 0x194   :  { %v757_v47 = vpop.f32.mrf.mxu0 }
 0x195   :  { %769 = vmatmul.mubr.msk.bf16.vlgmr.msra.gmra.mxu0 %vm270_vm4, %v257_v45 }
 0x196   :  { %779 = vmatpush3.bf16.msra.mxu0 %v971_v20  ;;  %782 = vmatprep.mubr.msk.bf16.mxu0 %vm836_vm1, %v835_v0 }
 0x197   :  { %780 = vmatprep.subr.bf16.mxu0 %v835_v0 }
 0x19a   :  { %781 = vmatpush3.bf16.msra.mxu0 %v981_v37 }
 0x19b   :  { %792 = vmatprep.subr.bf16.mxu0 %v835_v0 }
 0x19d   :  { %783 = vmatmul.mubr.msk.bf16.vlgmr.msra.gmra.mxu0 %vm270_vm4, %v360_v49 }
 0x19e   :  { %793 = vmatpush3.bf16.msra.mxu0 %v933_v8  ;;  %794 = vmatprep.mubr.msk.bf16.mxu0 %vm836_vm1, %v835_v0 }
 0x19f   :  { %804 = vmatprep.subr.bf16.mxu0 %v835_v0 }
 0x1a5   :  { %795 = vmatmul.mubr.msk.bf16.vlgmr.msra.gmra.mxu0 %vm162_vm3, %v455_v51 }
 0x1a6   :  { %805 = vmatpush3.bf16.msra.mxu0 %v971_v20  ;;  %808 = vmatprep.mubr.msk.bf16.mxu0 %vm836_vm1, %v835_v0 }
 0x1a7   :  { %806 = vmatprep.subr.bf16.mxu0 %v835_v0 }
 0x1aa   :  { %807 = vmatpush3.bf16.msra.mxu0 %v981_v37 }
 0x1ab   :  { %818 = vmatprep.subr.bf16.mxu0 %v835_v0 }
 0x255   :  { %v308_v60 = vpop.f32.mrf.mxu0 }
 0x256   :  { %314 = vst.msk [vmem:[%s1047_s12] sm:$0xff] %vm270_vm4, %v308_v60 }
 0x257   :  { %v770_v61 = vpop.f32.mrf.mxu0 }
 0x259   :  { %v311_v62 = vpop.f32.mrf.mxu0 }
 0x25b   :  { %v771_v63 = vpop.f32.mrf.mxu0 }
 0x25d   :  { %v398_v1 = vpop.f32.mrf.mxu0 }
 0x25e   :  { %405 = vrot.lane.b32.xlu0 %v398_v1, %s837_s11 }
 0x25f   :  { %v784_v2 = vpop.f32.mrf.mxu0 }
 0x261   :  { %v401_v3 = vpop.f32.mrf.mxu0 }
 0x263   :  { %v785_v4 = vpop.f32.mrf.mxu0 }
 0x265   :  { %v493_v5 = vpop.f32.mrf.mxu0 }
 0x266   :  { %v542_v6 = vadd.f32 %v536_v52, %v493_v5  ;;  %v637_v11 = vadd.f32 %v631_v56, %v493_v5 }
 0x267   :  { %v796_v7 = vpop.f32.mrf.mxu0 }
 0x268   :  { %v543_v8 = vmax.f32 %v542_v6, 0.0  ;;  %v638_v13 = vmax.f32 %v637_v11, 0.0 }
 0x269   :  { %v496_v9 = vpop.f32.mrf.mxu0 }
 0x26a   :  { %v544_v10 = vpack.c.bf16 %v543_v8, %v543_v8  ;;  %v639_v14 = vpack.c.bf16 %v638_v13, %v638_v13 }
 0x26b   :  { %v797_v12 = vpop.f32.mrf.mxu0 }
 0x26c   :  { %809 = vmatmul.mubr.msk.bf16.vlgmr.msra.gmra.mxu0 %vm270_vm4, %v544_v10 }
 0x26d   :  { %819 = vmatpush3.bf16.msra.mxu0 %v971_v20  ;;  %822 = vmatprep.mubr.msk.bf16.mxu0 %vm836_vm1, %v835_v0 }
 0x26e   :  { %820 = vmatprep.subr.bf16.mxu0 %v835_v0 }
 0x271   :  { %821 = vmatpush3.bf16.msra.mxu0 %v981_v37 }
 0x274   :  { %823 = vmatmul.mubr.msk.bf16.vlgmr.msra.gmra.mxu0 %vm270_vm4, %v639_v14 }
 0x2d0   :  { %v406_v15 = vpop.permute.xlu0 %405 }
 0x2d1   :  { %409 = vst.msk [vmem:[%s1047_s12] sm:$0xff] %vm408_vm5, %v406_v15 }
 0x32c   :  { %v582_v16 = vpop.f32.mrf.mxu0 }
 0x32d   :  { %589 = vrot.lane.b32.xlu0 %v582_v16, %s838_s22 }
 0x32e   :  { %v810_v17 = vpop.f32.mrf.mxu0 }
 0x330   :  { %v585_v18 = vpop.f32.mrf.mxu0 }
 0x332   :  { %v811_v19 = vpop.f32.mrf.mxu0 }
 0x334   :  { %v677_v20 = vpop.f32.mrf.mxu0 }
 0x335   :  { %684 = vrot.lane.b32.xlu1 %v677_v20, %s839_s23 }
 0x336   :  { %v824_v0 = vpop.f32.mrf.mxu0 }
 0x338   :  { %v680_v21 = vpop.f32.mrf.mxu0 }
 0x33a   :  { %v825_v22 = vpop.f32.mrf.mxu0 }
 0x39f   :  { %v590_v23 = vpop.permute.xlu0 %589 }
 0x3a0   :  { %593 = vst.msk [vmem:[%s1047_s12] sm:$0xff] %vm592_vm6, %v590_v23 }
 0x3a7   :  { %v685_v24 = vpop.permute.xlu1 %684 }
 0x3a8   :  { %688 = vst.msk [vmem:[%s1047_s12] sm:$0xff] %vm687_vm7, %v685_v24 }

</bundles_post_ra>
